<compile_context>
chip_gen: v5e
topology: v5e:2x2
jax: 0.10.0
libtpu: 0.0.40
codegen_flags: <defaults>
</compile_context>

<pallas_src>
import functools

import jax
import jax.numpy as jnp
from jax.experimental import pallas as pl
from jax.experimental.pallas import tpu as pltpu

N_CONVS = 5
LANES = 128
SUBLANES = 8


def _pair_indices(c):
    """Unique unordered channel pairs (i <= j) -- shared by kernel & wrapper."""
    return [(i, j) for i in range(c) for j in range(i, c)]


def fused_quad_kernel(x_ref, coef_ref, o_ref):
    # x_ref    : (C, TR, 128)                VMEM -- channel planes, lane-dense
    # coef_ref : (C * (n_pairs + C + 1),)    SMEM -- per-channel [A_c, v_c, s_c]
    # o_ref    : (C, TR, 128)                VMEM
    C = x_ref.shape[0]
    pairs = _pair_indices(C)
    n_pairs = len(pairs)
    stride = n_pairs + C + 1

    # Load each input channel plane once; reused by all products / channels.
    xs = [x_ref[c] for c in range(C)]
    # 6 unique pair products, shared across all output channels.
    prods = [xs[i] * xs[j] for (i, j) in pairs]

    for c in range(C):
        base = c * stride
        # Fold the constant term into the first FMA.
        acc = prods[0] * coef_ref[base + 0] + coef_ref[base + n_pairs + C]
        for p in range(1, n_pairs):
            acc = acc + prods[p] * coef_ref[base + p]
        for j in range(C):
            acc = acc + xs[j] * coef_ref[base + n_pairs + j]
        o_ref[c] = acc.astype(o_ref.dtype)


def _quad_coefs(weights, biases):
    """Flatten t1*t2 - t3*t4 + t5 into per-channel quadratic coefficients.

    weights: (5, C, C)  [k, out_c, in_c]     biases: (5, C)  [k, out_c]
    Returns flat (C * (n_pairs + C + 1),) float32 array laid out per channel as
    [pair coefs (i<=j)..., linear coefs..., constant].
    """
    W1, W2, W3, W4, W5 = (weights[k] for k in range(N_CONVS))
    b1, b2, b3, b4, b5 = (biases[k] for k in range(N_CONVS))
    C = W1.shape[0]

    # A[c, i, j] multiplies x_i * x_j in output channel c.
    A = W1[:, :, None] * W2[:, None, :] - W3[:, :, None] * W4[:, None, :]
    pair_cols = []
    for (i, j) in _pair_indices(C):
        pair_cols.append(A[:, i, i] if i == j else A[:, i, j] + A[:, j, i])
    P = jnp.stack(pair_cols, axis=1)                                   # (C, n_pairs)

    v = (b2[:, None] * W1 + b1[:, None] * W2
         - b4[:, None] * W3 - b3[:, None] * W4 + W5)                   # (C, C)
    s = (b1 * b2 - b3 * b4 + b5)[:, None]                              # (C, 1)

    return jnp.concatenate([P, v, s], axis=1).reshape(-1).astype(jnp.float32)


def _round_up(n, m):
    return -(-n // m) * m


@functools.partial(jax.jit, static_argnames=("max_tile_rows",))
def model_forward(x, weights, biases, *, max_tile_rows=512):
    """x: (B, C, H, W) float32 (NCHW, like PyTorch). Returns (B, C, H, W)."""
    B, C, H, W = x.shape
    N = B * H * W

    # Rows of 128 lanes per channel; pad rows to a multiple of 8 (sublanes).
    rows = _round_up(-(-N // LANES), SUBLANES)
    # Prefer >= 2 grid tiles so the 'parallel' axis feeds both v7x TensorCores,
    # while capping tile size at max_tile_rows (v5e scoped-VMEM safe).
    min_tiles = 2 if rows >= 2 * SUBLANES else 1
    tile_rows = min(max_tile_rows, _round_up(-(-rows // min_tiles), SUBLANES))
    num_tiles = -(-rows // tile_rows)
    rows_pad = num_tiles * tile_rows

    # (B, C, H, W) -> (C, B*H*W); for B == 1 this transpose is a free reshape
    # (and under jit it fuses with the pad below).
    # TODO(synk): for B > 1 a batched (B, C, HW/128, 128) layout with a leading
    #             grid axis would avoid the HBM transpose; B=1 here so skipped.
    x2d = jnp.transpose(x, (1, 0, 2, 3)).reshape(C, N)
    pad = rows_pad * LANES - N
    if pad:
        x2d = jnp.pad(x2d, ((0, 0), (0, pad)))
    x3d = x2d.reshape(C, rows_pad, LANES).astype(jnp.float32)

    coef_flat = _quad_coefs(weights.astype(jnp.float32),
                            biases.astype(jnp.float32))

    n_pairs = C * (C + 1) // 2
    cost = pl.CostEstimate(
        flops=int(rows_pad * LANES * (n_pairs + 2 * C * (n_pairs + C))),
        transcendentals=0,
        bytes_accessed=int(2 * C * rows_pad * LANES * 4),
    )

    out3d = pl.pallas_call(
        fused_quad_kernel,
        out_shape=jax.ShapeDtypeStruct((C, rows_pad, LANES), jnp.float32),
        grid_spec=pltpu.PrefetchScalarGridSpec(
            num_scalar_prefetch=0,
            grid=(num_tiles,),
            in_specs=[
                pl.BlockSpec((C, tile_rows, LANES), lambda i: (0, i, 0)),
                pl.BlockSpec(memory_space=pltpu.MemorySpace.SMEM),
            ],
            out_specs=pl.BlockSpec((C, tile_rows, LANES), lambda i: (0, i, 0)),
        ),
        compiler_params=pltpu.CompilerParams(
            dimension_semantics=("parallel",),
        ),
        cost_estimate=cost,
    )(x3d, coef_flat)

    out2d = out3d.reshape(C, rows_pad * LANES)[:, :N]
    return jnp.transpose(out2d.reshape(C, B, H, W), (1, 0, 2, 3))


def reference_forward(x, weights, biases):
    """Plain-JAX reference of the same (well-defined) semantics."""
    B, C, H, W = x.shape
    x2d = jnp.transpose(x, (1, 0, 2, 3)).reshape(C, -1)
    outs = [weights[k] @ x2d + biases[k][:, None] for k in range(N_CONVS)]
    t1, t2, t3, t4, t5 = outs
    o = t1 * t2 - t3 * t4 + t5
    return jnp.transpose(o.reshape(C, B, H, W), (1, 0, 2, 3))


def init_params(key, c_in=3, c_out=3, n_convs=N_CONVS):
    """Deterministic init mimicking PyTorch Conv2d (uniform +/- 1/sqrt(fan_in))."""
    bound = 1.0 / jnp.sqrt(jnp.float32(c_in))  # kernel is 1x1 -> fan_in = c_in
    kw, kb = jax.random.split(key)
    weights = jax.random.uniform(
        kw, (n_convs, c_out, c_in), jnp.float32, -bound, bound)
    biases = jax.random.uniform(
        kb, (n_convs, c_out), jnp.float32, -bound, bound)
    return weights, biases


if __name__ == "__main__":
    key = jax.random.PRNGKey(0)
    kx, kp = jax.random.split(key)

    # Shape implied by the module: (1, 3, 128, 64), NCHW.
    x = jax.random.normal(kx, (1, 3, 128, 64), dtype=jnp.float32)
    weights, biases = init_params(kp)

    out = model_forward(x, weights, biases)
    out = jax.block_until_ready(out)

    ref = reference_forward(x, weights, biases)
    assert out.shape == (1, 3, 128, 64)
    # Slightly relaxed tolerance: quadratic-form reassociation vs product-of-sums.
    assert jnp.allclose(out, ref, atol=1e-4, rtol=1e-4)

    print("KERNEL_OK")
</pallas_src>

<mosaic_0001>
module attributes {stable_mosaic.version = 11 : i64} {
  func.func @fused_quad_kernel(%arg0: i32, %arg1: memref<3x32x128xf32, #tpu.memory_space<vmem>>, %arg2: memref<30xf32, #tpu.memory_space<smem>>, %arg3: memref<3x32x128xf32, #tpu.memory_space<vmem>>) attributes {dimension_semantics = [#tpu.dimension_semantics<parallel>], iteration_bounds = array<i64: 2>, scalar_prefetch = 0 : i64, scratch_operands = 0 : i64, tpu.core_type = #tpu.core_type<tc>, window_params = [{transform_indices = @transform_0, window_bounds = array<i64: 3, 32, 128>}, {transform_indices = @transform_1, window_bounds = array<i64: 30>}, {transform_indices = @transform_2, window_bounds = array<i64: 3, 32, 128>}]} {
    %c0 = arith.constant 0 : index
    %c0_0 = arith.constant 0 : index
    %c0_1 = arith.constant 0 : index
    %0 = vector.load %arg1[%c0, %c0_0, %c0_1] : memref<3x32x128xf32, #tpu.memory_space<vmem>>, vector<1x32x128xf32>
    %1 = vector.shape_cast %0 : vector<1x32x128xf32> to vector<32x128xf32>
    %c1 = arith.constant 1 : index
    %c0_2 = arith.constant 0 : index
    %c0_3 = arith.constant 0 : index
    %2 = vector.load %arg1[%c1, %c0_2, %c0_3] : memref<3x32x128xf32, #tpu.memory_space<vmem>>, vector<1x32x128xf32>
    %3 = vector.shape_cast %2 : vector<1x32x128xf32> to vector<32x128xf32>
    %c2 = arith.constant 2 : index
    %c0_4 = arith.constant 0 : index
    %c0_5 = arith.constant 0 : index
    %4 = vector.load %arg1[%c2, %c0_4, %c0_5] : memref<3x32x128xf32, #tpu.memory_space<vmem>>, vector<1x32x128xf32>
    %5 = vector.shape_cast %4 : vector<1x32x128xf32> to vector<32x128xf32>
    %6 = arith.mulf %1, %1 : vector<32x128xf32>
    %7 = arith.mulf %1, %3 : vector<32x128xf32>
    %8 = arith.mulf %1, %5 : vector<32x128xf32>
    %9 = arith.mulf %3, %3 : vector<32x128xf32>
    %10 = arith.mulf %3, %5 : vector<32x128xf32>
    %11 = arith.mulf %5, %5 : vector<32x128xf32>
    %c0_6 = arith.constant 0 : index
    %12 = memref.load %arg2[%c0_6] : memref<30xf32, #tpu.memory_space<smem>>
    %13 = vector.broadcast %12 : f32 to vector<32x128xf32>
    %14 = arith.mulf %6, %13 : vector<32x128xf32>
    %c9 = arith.constant 9 : index
    %15 = memref.load %arg2[%c9] : memref<30xf32, #tpu.memory_space<smem>>
    %16 = vector.broadcast %15 : f32 to vector<32x128xf32>
    %17 = arith.addf %14, %16 : vector<32x128xf32>
    %c1_7 = arith.constant 1 : index
    %18 = memref.load %arg2[%c1_7] : memref<30xf32, #tpu.memory_space<smem>>
    %19 = vector.broadcast %18 : f32 to vector<32x128xf32>
    %20 = arith.mulf %7, %19 : vector<32x128xf32>
    %21 = arith.addf %17, %20 : vector<32x128xf32>
    %c2_8 = arith.constant 2 : index
    %22 = memref.load %arg2[%c2_8] : memref<30xf32, #tpu.memory_space<smem>>
    %23 = vector.broadcast %22 : f32 to vector<32x128xf32>
    %24 = arith.mulf %8, %23 : vector<32x128xf32>
    %25 = arith.addf %21, %24 : vector<32x128xf32>
    %c3 = arith.constant 3 : index
    %26 = memref.load %arg2[%c3] : memref<30xf32, #tpu.memory_space<smem>>
    %27 = vector.broadcast %26 : f32 to vector<32x128xf32>
    %28 = arith.mulf %9, %27 : vector<32x128xf32>
    %29 = arith.addf %25, %28 : vector<32x128xf32>
    %c4 = arith.constant 4 : index
    %30 = memref.load %arg2[%c4] : memref<30xf32, #tpu.memory_space<smem>>
    %31 = vector.broadcast %30 : f32 to vector<32x128xf32>
    %32 = arith.mulf %10, %31 : vector<32x128xf32>
    %33 = arith.addf %29, %32 : vector<32x128xf32>
    %c5 = arith.constant 5 : index
    %34 = memref.load %arg2[%c5] : memref<30xf32, #tpu.memory_space<smem>>
    %35 = vector.broadcast %34 : f32 to vector<32x128xf32>
    %36 = arith.mulf %11, %35 : vector<32x128xf32>
    %37 = arith.addf %33, %36 : vector<32x128xf32>
    %c6 = arith.constant 6 : index
    %38 = memref.load %arg2[%c6] : memref<30xf32, #tpu.memory_space<smem>>
    %39 = vector.broadcast %38 : f32 to vector<32x128xf32>
    %40 = arith.mulf %1, %39 : vector<32x128xf32>
    %41 = arith.addf %37, %40 : vector<32x128xf32>
    %c7 = arith.constant 7 : index
    %42 = memref.load %arg2[%c7] : memref<30xf32, #tpu.memory_space<smem>>
    %43 = vector.broadcast %42 : f32 to vector<32x128xf32>
    %44 = arith.mulf %3, %43 : vector<32x128xf32>
    %45 = arith.addf %41, %44 : vector<32x128xf32>
    %c8 = arith.constant 8 : index
    %46 = memref.load %arg2[%c8] : memref<30xf32, #tpu.memory_space<smem>>
    %47 = vector.broadcast %46 : f32 to vector<32x128xf32>
    %48 = arith.mulf %5, %47 : vector<32x128xf32>
    %49 = arith.addf %45, %48 : vector<32x128xf32>
    %c0_9 = arith.constant 0 : index
    %c0_10 = arith.constant 0 : index
    %c0_11 = arith.constant 0 : index
    %50 = vector.load %arg3[%c0_9, %c0_10, %c0_11] : memref<3x32x128xf32, #tpu.memory_space<vmem>>, vector<1x32x128xf32>
    %51 = vector.shape_cast %50 : vector<1x32x128xf32> to vector<32x128xf32>
    %52 = vector.shape_cast %49 : vector<32x128xf32> to vector<1x32x128xf32>
    tpu.vector_store %arg3[%c0_9, %c0_10, %c0_11], %52 {strides = array<i32>} : memref<3x32x128xf32, #tpu.memory_space<vmem>>, vector<1x32x128xf32>,
    %c10 = arith.constant 10 : index
    %53 = memref.load %arg2[%c10] : memref<30xf32, #tpu.memory_space<smem>>
    %54 = vector.broadcast %53 : f32 to vector<32x128xf32>
    %55 = arith.mulf %6, %54 : vector<32x128xf32>
    %c19 = arith.constant 19 : index
    %56 = memref.load %arg2[%c19] : memref<30xf32, #tpu.memory_space<smem>>
    %57 = vector.broadcast %56 : f32 to vector<32x128xf32>
    %58 = arith.addf %55, %57 : vector<32x128xf32>
    %c11 = arith.constant 11 : index
    %59 = memref.load %arg2[%c11] : memref<30xf32, #tpu.memory_space<smem>>
    %60 = vector.broadcast %59 : f32 to vector<32x128xf32>
    %61 = arith.mulf %7, %60 : vector<32x128xf32>
    %62 = arith.addf %58, %61 : vector<32x128xf32>
    %c12 = arith.constant 12 : index
    %63 = memref.load %arg2[%c12] : memref<30xf32, #tpu.memory_space<smem>>
    %64 = vector.broadcast %63 : f32 to vector<32x128xf32>
    %65 = arith.mulf %8, %64 : vector<32x128xf32>
    %66 = arith.addf %62, %65 : vector<32x128xf32>
    %c13 = arith.constant 13 : index
    %67 = memref.load %arg2[%c13] : memref<30xf32, #tpu.memory_space<smem>>
    %68 = vector.broadcast %67 : f32 to vector<32x128xf32>
    %69 = arith.mulf %9, %68 : vector<32x128xf32>
    %70 = arith.addf %66, %69 : vector<32x128xf32>
    %c14 = arith.constant 14 : index
    %71 = memref.load %arg2[%c14] : memref<30xf32, #tpu.memory_space<smem>>
    %72 = vector.broadcast %71 : f32 to vector<32x128xf32>
    %73 = arith.mulf %10, %72 : vector<32x128xf32>
    %74 = arith.addf %70, %73 : vector<32x128xf32>
    %c15 = arith.constant 15 : index
    %75 = memref.load %arg2[%c15] : memref<30xf32, #tpu.memory_space<smem>>
    %76 = vector.broadcast %75 : f32 to vector<32x128xf32>
    %77 = arith.mulf %11, %76 : vector<32x128xf32>
    %78 = arith.addf %74, %77 : vector<32x128xf32>
    %c16 = arith.constant 16 : index
    %79 = memref.load %arg2[%c16] : memref<30xf32, #tpu.memory_space<smem>>
    %80 = vector.broadcast %79 : f32 to vector<32x128xf32>
    %81 = arith.mulf %1, %80 : vector<32x128xf32>
    %82 = arith.addf %78, %81 : vector<32x128xf32>
    %c17 = arith.constant 17 : index
    %83 = memref.load %arg2[%c17] : memref<30xf32, #tpu.memory_space<smem>>
    %84 = vector.broadcast %83 : f32 to vector<32x128xf32>
    %85 = arith.mulf %3, %84 : vector<32x128xf32>
    %86 = arith.addf %82, %85 : vector<32x128xf32>
    %c18 = arith.constant 18 : index
    %87 = memref.load %arg2[%c18] : memref<30xf32, #tpu.memory_space<smem>>
    %88 = vector.broadcast %87 : f32 to vector<32x128xf32>
    %89 = arith.mulf %5, %88 : vector<32x128xf32>
    %90 = arith.addf %86, %89 : vector<32x128xf32>
    %c1_12 = arith.constant 1 : index
    %c0_13 = arith.constant 0 : index
    %c0_14 = arith.constant 0 : index
    %91 = vector.load %arg3[%c1_12, %c0_13, %c0_14] : memref<3x32x128xf32, #tpu.memory_space<vmem>>, vector<1x32x128xf32>
    %92 = vector.shape_cast %91 : vector<1x32x128xf32> to vector<32x128xf32>
    %93 = vector.shape_cast %90 : vector<32x128xf32> to vector<1x32x128xf32>
    tpu.vector_store %arg3[%c1_12, %c0_13, %c0_14], %93 {strides = array<i32>} : memref<3x32x128xf32, #tpu.memory_space<vmem>>, vector<1x32x128xf32>,
    %c20 = arith.constant 20 : index
    %94 = memref.load %arg2[%c20] : memref<30xf32, #tpu.memory_space<smem>>
    %95 = vector.broadcast %94 : f32 to vector<32x128xf32>
    %96 = arith.mulf %6, %95 : vector<32x128xf32>
    %c29 = arith.constant 29 : index
    %97 = memref.load %arg2[%c29] : memref<30xf32, #tpu.memory_space<smem>>
    %98 = vector.broadcast %97 : f32 to vector<32x128xf32>
    %99 = arith.addf %96, %98 : vector<32x128xf32>
    %c21 = arith.constant 21 : index
    %100 = memref.load %arg2[%c21] : memref<30xf32, #tpu.memory_space<smem>>
    %101 = vector.broadcast %100 : f32 to vector<32x128xf32>
    %102 = arith.mulf %7, %101 : vector<32x128xf32>
    %103 = arith.addf %99, %102 : vector<32x128xf32>
    %c22 = arith.constant 22 : index
    %104 = memref.load %arg2[%c22] : memref<30xf32, #tpu.memory_space<smem>>
    %105 = vector.broadcast %104 : f32 to vector<32x128xf32>
    %106 = arith.mulf %8, %105 : vector<32x128xf32>
    %107 = arith.addf %103, %106 : vector<32x128xf32>
    %c23 = arith.constant 23 : index
    %108 = memref.load %arg2[%c23] : memref<30xf32, #tpu.memory_space<smem>>
    %109 = vector.broadcast %108 : f32 to vector<32x128xf32>
    %110 = arith.mulf %9, %109 : vector<32x128xf32>
    %111 = arith.addf %107, %110 : vector<32x128xf32>
    %c24 = arith.constant 24 : index
    %112 = memref.load %arg2[%c24] : memref<30xf32, #tpu.memory_space<smem>>
    %113 = vector.broadcast %112 : f32 to vector<32x128xf32>
    %114 = arith.mulf %10, %113 : vector<32x128xf32>
    %115 = arith.addf %111, %114 : vector<32x128xf32>
    %c25 = arith.constant 25 : index
    %116 = memref.load %arg2[%c25] : memref<30xf32, #tpu.memory_space<smem>>
    %117 = vector.broadcast %116 : f32 to vector<32x128xf32>
    %118 = arith.mulf %11, %117 : vector<32x128xf32>
    %119 = arith.addf %115, %118 : vector<32x128xf32>
    %c26 = arith.constant 26 : index
    %120 = memref.load %arg2[%c26] : memref<30xf32, #tpu.memory_space<smem>>
    %121 = vector.broadcast %120 : f32 to vector<32x128xf32>
    %122 = arith.mulf %1, %121 : vector<32x128xf32>
    %123 = arith.addf %119, %122 : vector<32x128xf32>
    %c27 = arith.constant 27 : index
    %124 = memref.load %arg2[%c27] : memref<30xf32, #tpu.memory_space<smem>>
    %125 = vector.broadcast %124 : f32 to vector<32x128xf32>
    %126 = arith.mulf %3, %125 : vector<32x128xf32>
    %127 = arith.addf %123, %126 : vector<32x128xf32>
    %c28 = arith.constant 28 : index
    %128 = memref.load %arg2[%c28] : memref<30xf32, #tpu.memory_space<smem>>
    %129 = vector.broadcast %128 : f32 to vector<32x128xf32>
    %130 = arith.mulf %5, %129 : vector<32x128xf32>
    %131 = arith.addf %127, %130 : vector<32x128xf32>
    %c2_15 = arith.constant 2 : index
    %c0_16 = arith.constant 0 : index
    %c0_17 = arith.constant 0 : index
    %132 = vector.load %arg3[%c2_15, %c0_16, %c0_17] : memref<3x32x128xf32, #tpu.memory_space<vmem>>, vector<1x32x128xf32>
    %133 = vector.shape_cast %132 : vector<1x32x128xf32> to vector<32x128xf32>
    %134 = vector.shape_cast %131 : vector<32x128xf32> to vector<1x32x128xf32>
    tpu.vector_store %arg3[%c2_15, %c0_16, %c0_17], %134 {strides = array<i32>} : memref<3x32x128xf32, #tpu.memory_space<vmem>>, vector<1x32x128xf32>,
    return
  }
  func.func @transform_0(%arg0: i32) -> (i32, i32, i32) {
    %c0_i32 = arith.constant 0 : i32
    %c0_i32_0 = arith.constant 0 : i32
    %c0_i32_1 = arith.constant 0 : i32
    return %c0_i32, %arg0, %c0_i32_0 : i32, i32, i32
  }
  func.func @transform_1(%arg0: i32) -> i32 {
    %c0_i32 = arith.constant 0 : i32
    %c0_i32_0 = arith.constant 0 : i32
    return %c0_i32 : i32
  }
  func.func @transform_2(%arg0: i32) -> (i32, i32, i32) {
    %c0_i32 = arith.constant 0 : i32
    %c0_i32_0 = arith.constant 0 : i32
    %c0_i32_1 = arith.constant 0 : i32
    return %c0_i32, %arg0, %c0_i32_0 : i32, i32, i32
  }
}

</mosaic_0001>

<bundles_post_ra>
// kernel: model_forward.1
= control target key start
LH: loop header
LB: loop body
LE: loop exit
PB: predicated region body
PF: predicated region fallthrough
CT: control target
= control target key end

     0   :  { %7 = vsyncpa [#allocation4], 0  ;;  %s873_s9 = smov 0   ;;  %s875_s10 = smov 0   ;;  %s1433_s0 = inlined_call_operand.vmem [shape: f32[3,64,128], index: 0, kind: input, shape index: {}]   ;;  %s1434_s1 = inlined_call_operand.vmem [shape: f32[30], index: 1, kind: input, shape index: {}]   ;;  %s1435_s2 = inlined_call_operand.vmem [shape: f32[3,64,128], index: 2, kind: output, shape index: {}]  }
   0x1   :  { %s877_s11 = smov 0  }
   0x2 LB: > { %s889_s12 = sadd.s32 4294967295, %s855_s11   ;;  %s892_s13 = sadd.s32 1, %s855_s11   ;;  %s855_s11 = sphi %s877_s11, %s1467_s11   ;;  %s851_s10 = sphi %s875_s10, %s1466_s10   ;;  %s847_s9 = sphi %s873_s9, %s1465_s9  }
   0x3   : > { %s17_s14 = ssub.s32 %s855_s11, %s892_s13  ;;  %s20_s15 = sadd.s32 1, %s851_s10 }
   0x4   : > { %p18_p0 = scmp.eq.s32.totalorder %s17_s14, 0  ;;  %p27_p1 = scmp.ne.s32.totalorder %s851_s10, %s847_s9 }
   0x5   : > { %p28_p2 = scmp.eq.s32.totalorder %s855_s11, 0  ;;  %p78_p3 = scmp.eq.s32.totalorder %s889_s12, 1 }
   0x6   : > { %s902_s16 = scalar_select %p18_p0, %s851_s10, %s20_s15  }
   0x7   : > { %p904_p4 = por %p28_p2, %p27_p1  ;;  %p908_p5 = por %p78_p3, %p27_p1 }
   0x8   : > { %p719_p6 = scmp.ge.s32.totalorder %s855_s11, 1  ;;  %p91_p7 = scmp.lt.s32.totalorder %s855_s11, 3 }
   0x9   : > { %p787_p8 = scmp.eq.s32.totalorder %s889_s12, 0  ;;  %s103_s22 = sshll.u32 %s1434_s1, 4  ;;  %s104_s22 = int_to_ptr.vmem [resolvable:$true] %s103_s22 }
   0xa   : > { %p915_p9 = pnand %p719_p6, %p91_p7  ;;  %s857_s23 = smov [#allocation3]  }
   0xb   : > { %p721_p12 = scmp.ge.s32.totalorder %s855_s11, 2 }
   0xc   : > { %p783_p10 = pneg %p915_p9 }
   0xd   : > { %110 = sbr.rel (%p721_p12) target bundleno = 34 (0x22), region = 20 }
   0xe   : > { %p784_p11 = pnand %p787_p8, %p783_p10 }
  0x10   : > { %786 = dma.vmem_to_smem (!%p784_p11), %s104_s22, 16, %s857_s23, [#allocation4]  }
  0x12   : > { %113 = sbr.rel (!%p904_p4) target bundleno = 34 (0x22), region = 24  ;;  %s115_s24 = sand.u32 (%p904_p4), 1, %s851_s10  }
  0x13   : > { %s775_s25 = sshll.u32 (%p904_p4), %s855_s11, 5  ;;  %s777_s26 = smul.u32 (%p904_p4), 96, %s115_s24 }
  0x14   : > { %s120_s29 = scalar_lea.vmem (%p904_p4), %s1433_s0, %s775_s25 }
  0x15   : > { %v171_v0 = vld [vmem:[%s120_s29] sm:$0xff] (%p904_p4)  ;;  %v173_v1 = vld [vmem:[%s120_s29 + $0x8] sm:$0xff] (%p904_p4)  ;;  %v175_v2 = vld [vmem:[%s120_s29 + $0x10] sm:$0xff] (%p904_p4)  ;;  %s117_s30 = scalar_lea.vmem (%p904_p4), [#allocation2], %s777_s26 }
  0x16   : > { %172 = vst [vmem:[%s117_s30] sm:$0xff] (%p904_p4), %v171_v0  ;;  %v177_v3 = vld [vmem:[%s120_s29 + $0x18] sm:$0xff] (%p904_p4)  ;;  %v179_v4 = vld [vmem:[%s120_s29 + $0x40] sm:$0xff] (%p904_p4)  ;;  %v181_v5 = vld [vmem:[%s120_s29 + $0x48] sm:$0xff] (%p904_p4) }
  0x17   : > { %174 = vst [vmem:[%s117_s30 + $0x8] sm:$0xff] %v173_v1  ;;  %v183_v6 = vld [vmem:[%s120_s29 + $0x50] sm:$0xff]  ;;  %v185_v7 = vld [vmem:[%s120_s29 + $0x58] sm:$0xff]  ;;  %v187_v8 = vld [vmem:[%s120_s29 + $0x80] sm:$0xff] }
  0x18   : > { %176 = vst [vmem:[%s117_s30 + $0x10] sm:$0xff] %v175_v2  ;;  %v189_v9 = vld [vmem:[%s120_s29 + $0x88] sm:$0xff]  ;;  %v191_v10 = vld [vmem:[%s120_s29 + $0x90] sm:$0xff]  ;;  %v193_v11 = vld [vmem:[%s120_s29 + $0x98] sm:$0xff] }
  0x19   : > { %178 = vst [vmem:[%s117_s30 + $0x18] sm:$0xff] %v177_v3 }
  0x1a   : > { %180 = vst [vmem:[%s117_s30 + $0x20] sm:$0xff] %v179_v4 }
  0x1b   : > { %182 = vst [vmem:[%s117_s30 + $0x28] sm:$0xff] %v181_v5 }
  0x1c   : > { %184 = vst [vmem:[%s117_s30 + $0x30] sm:$0xff] %v183_v6 }
  0x1d   : > { %186 = vst [vmem:[%s117_s30 + $0x38] sm:$0xff] %v185_v7 }
  0x1e   : > { %188 = vst [vmem:[%s117_s30 + $0x40] sm:$0xff] %v187_v8 }
  0x1f   : > { %190 = vst [vmem:[%s117_s30 + $0x48] sm:$0xff] %v189_v9 }
  0x20   : > { %192 = vst [vmem:[%s117_s30 + $0x50] sm:$0xff] %v191_v10 }
  0x21   : > { %194 = vst [vmem:[%s117_s30 + $0x58] sm:$0xff] %v193_v11 }
  0x22 PF: > { %203 = sbr.rel (%p915_p9) target bundleno = 133 (0x85), region = 62 }
  0x27   : > { %s206_s3 = sand.u32 1, %s847_s9  }
  0x28   : > { %s937_s4 = smul.u32 96, %s206_s3 }
  0x2a   : > { %s940_s5 = scalar_lea.vmem [#allocation2], %s937_s4 }
  0x2b   : > { %842 = dma.done.wait (%p787_p8), [#allocation4], 16  }
  0x2c   : > { %844 = vsyncadd (%p787_p8), [#allocation4], 4294967280 }
  0x2d   : > { %217 = sfence }
  0x2e   : > { %v947_v12 = vld [vmem:[%s940_s5] sm:$0xff]  ;;  %s955_s6 = sld [smem:[#allocation3]]  ;;  %v960_v15 = vld [vmem:[%s940_s5 + $0x8] sm:$0xff]  ;;  %v983_v21 = vld [vmem:[%s940_s5 + $0x10] sm:$0xff]  ;;  %s1179_s3 = scalar_lea.vmem [#allocation5], %s937_s4 }
  0x2f   : > { %v950_v13 = vld [vmem:[%s940_s5 + $0x20] sm:$0xff]  ;;  %s957_s7 = sld [smem:[#allocation3 + $0x9]]  ;;  %1452 = vst [vmem:[#allocation8_spill] sm:$0xff] %v960_v15  ;;  %v963_v16 = vld [vmem:[%s940_s5 + $0x28] sm:$0xff]  ;;  %v970_v18 = vmul.f32 %v947_v12, %v947_v12  ;;  %v986_v22 = vld [vmem:[%s940_s5 + $0x30] sm:$0xff]  ;;  %v1007_v27 = vmul.f32 %v960_v15, %v960_v15  ;;  %v1038_v34 = vmul.f32 %v983_v21, %v983_v21 }
  0x30   : > { %v953_v14 = vld [vmem:[%s940_s5 + $0x40] sm:$0xff]  ;;  %1453 = vst [vmem:[#allocation9_spill] sm:$0xff] %v963_v16  ;;  %v966_v17 = vld [vmem:[%s940_s5 + $0x48] sm:$0xff]  ;;  %v974_v19 = vmul.f32 %v950_v13, %v947_v12  ;;  %s980_s8 = sld [smem:[#allocation3 + $0x1]]  ;;  %v989_v23 = vld [vmem:[%s940_s5 + $0x50] sm:$0xff]  ;;  %v993_v24 = vmul.f32 %v950_v13, %v950_v13  ;;  %v1013_v28 = vmul.f32 %v963_v16, %v960_v15  ;;  %v1021_v30 = vmul.f32 %v963_v16, %v963_v16 }
  0x31   : > { %1451 = vst [vmem:[#allocation7_spill] sm:$0xff] %v953_v14  ;;  %v978_v20 = vmul.f32 %v953_v14, %v947_v12  ;;  %v997_v25 = vmul.f32 %v953_v14, %v950_v13  ;;  %v1001_v26 = vmul.f32 %v953_v14, %v953_v14  ;;  %s1003_s9 = sld [smem:[#allocation3 + $0x2]]  ;;  %v1017_v29 = vmul.f32 %v966_v17, %v960_v15  ;;  %v1028_v32 = vld [vmem:[%s940_s5 + $0x18] sm:$0xff] }
  0x32   : > { %1454 = vst [vmem:[#allocation10_spill] sm:$0xff] %v966_v17  ;;  %s1009_s11 = sld [smem:[#allocation3 + $0x3]]  ;;  %v1025_v31 = vmul.f32 %v966_v17, %v963_v16  ;;  %v1034_v33 = vmul.f32 %v966_v17, %v966_v17  ;;  %v1042_v35 = vmul.f32 %v986_v22, %v983_v21  ;;  %v1046_v36 = vmul.f32 %v989_v23, %v983_v21  ;;  %v1049_v37 = vld [vmem:[%s940_s5 + $0x38] sm:$0xff] }
  0x33   : > { %s1030_s14 = sld [smem:[#allocation3 + $0x4]]  ;;  %v1052_v38 = vld [vmem:[%s940_s5 + $0x58] sm:$0xff]  ;;  %v1057_v40 = vmul.f32 %v986_v22, %v986_v22  ;;  %v1061_v41 = vmul.f32 %v989_v23, %v986_v22  ;;  %v1065_v42 = vmul.f32 %v989_v23, %v989_v23  ;;  %v1072_v46 = vmul.f32 %v1028_v32, %v1028_v32 }
  0x34   : > { %1455 = vst [vmem:[#allocation11_spill] sm:$0xff] %v1034_v33  ;;  %v273_v39 = vstv %s955_s6  ;;  %s739_s15 = sld [smem:[#allocation3 + $0x5]]  ;;  %v1077_v48 = vmul.f32 %v1049_v37, %v1028_v32  ;;  %v1081_v49 = vmul.f32 %v1052_v38, %v1028_v32  ;;  %v1085_v50 = vmul.f32 %v1049_v37, %v1049_v37 }
  0x35   : > { %1456 = vst [vmem:[#allocation12_spill] sm:$0xff] %v1046_v36  ;;  %v274_v43 = vmul.f32 %v273_v39, %v970_v18  ;;  %v279_v44 = vstv %s957_s7  ;;  %s740_s17 = sld [smem:[#allocation3 + $0x6]]  ;;  %v275_v45 = vmul.f32 %v273_v39, %v1007_v27  ;;  %v1097_v62 = vmul.f32 %v1052_v38, %v1049_v37 }
  0x36   : > { %1457 = vst [vmem:[#allocation13_spill] sm:$0xff] %v1072_v46  ;;  %v285_v47 = vstv %s980_s8  ;;  %s741_s19 = sld [smem:[#allocation3 + $0x7]]  ;;  %v276_v2 = vmul.f32 %v273_v39, %v1038_v34  ;;  %v1106_v6 = vmul.f32 %v1052_v38, %v1052_v38  ;;  %v277_v10 = vmul.f32 %v273_v39, %v1072_v46 }
  0x37   : > { %v280_v51 = vadd.f32 %v279_v44, %v274_v43  ;;  %v286_v52 = vmul.f32 %v285_v47, %v974_v19  ;;  %v295_v53 = vstv %s1003_s9  ;;  %s742_s20 = sld [smem:[#allocation3 + $0x8]]  ;;  %v281_v54 = vadd.f32 %v279_v44, %v275_v45 }
  0x38   : > { %v296_v55 = vmul.f32 %v295_v53, %v978_v20  ;;  %v305_v56 = vstv %s1009_s11  ;;  %v287_v57 = vmul.f32 %v285_v47, %v1013_v28  ;;  %v297_v58 = vmul.f32 %v295_v53, %v1017_v29  ;;  %s1116_s21 = sld [smem:[#allocation3 + $0xa]] }
  0x39   : > { %v290_v59 = vadd.f32 %v286_v52, %v280_v51  ;;  %v306_v60 = vmul.f32 %v305_v56, %v993_v24  ;;  %v315_v61 = vstv %s1030_s14  ;;  %v307_v1 = vmul.f32 %v305_v56, %v1021_v30  ;;  %s1122_s22 = sld [smem:[#allocation3 + $0x13]] }
  0x3a   : > { %v325_v63 = vstv %s739_s15  ;;  %v291_v0 = vadd.f32 %v287_v57, %v281_v54  ;;  %v316_v4 = vmul.f32 %v315_v61, %v997_v25  ;;  %v317_v9 = vmul.f32 %v315_v61, %v1025_v31  ;;  %s1128_s23 = sld [smem:[#allocation3 + $0xb]] }
  0x3b   : > { %v300_v3 = vadd.f32 %v296_v55, %v290_v59  ;;  %v1102_v5 = vstv %s740_s17  ;;  %v326_v43 = vmul.f32 %v325_v63, %v1001_v26  ;;  %v327_v51 = vmul.f32 %v325_v63, %v1034_v33  ;;  %s1136_s24 = sld [smem:[#allocation3 + $0xc]] }
  0x3c   : > { %v1108_v7 = vstv %s741_s19  ;;  %v301_v8 = vadd.f32 %v297_v58, %v291_v0  ;;  %v336_v52 = vmul.f32 %v1102_v5, %v947_v12  ;;  %v337_v55 = vmul.f32 %v1102_v5, %v960_v15  ;;  %s1140_s25 = sld [smem:[#allocation3 + $0xd]]  ;;  %s776_s19 = sshll.u32 (%p908_p5), %s889_s12, 5 }
  0x3d   : > { %v310_v11 = vadd.f32 %v306_v60, %v300_v3  ;;  %v1113_v45 = vstv %s742_s20  ;;  %v282_v57 = vadd.f32 %v279_v44, %v276_v2  ;;  %v346_v58 = vmul.f32 %v950_v13, %v1108_v7  ;;  %s1144_s26 = sld [smem:[#allocation3 + $0xe]] }
  0x3e   : > { %v311_v54 = vadd.f32 %v307_v1, %v301_v8  ;;  %v288_v59 = vmul.f32 %v285_v47, %v1042_v35  ;;  %v298_v60 = vmul.f32 %v295_v53, %v1046_v36  ;;  %v356_v0 = vmul.f32 %v953_v14, %v1113_v45  ;;  %s1152_s27 = sld [smem:[#allocation3 + $0xf]] }
  0x3f   : > { %v320_v39 = vadd.f32 %v316_v4, %v310_v11  ;;  %v347_v3 = vmul.f32 %v963_v16, %v1108_v7  ;;  %v357_v2 = vmul.f32 %v966_v17, %v1113_v45  ;;  %v308_v11 = vmul.f32 %v305_v56, %v1057_v40  ;;  %s1156_s28 = sld [smem:[#allocation3 + $0x10]] }
  0x40   : > { %v321_v1 = vadd.f32 %v317_v9, %v311_v54  ;;  %v292_v8 = vadd.f32 %v288_v59, %v282_v57  ;;  %v318_v46 = vmul.f32 %v315_v61, %v1061_v41  ;;  %v283_v15 = vadd.f32 %v279_v44, %v277_v10  ;;  %s1164_s29 = sld [smem:[#allocation3 + $0x11]] }
  0x41   : > { %v330_v4 = vadd.f32 %v326_v43, %v320_v39  ;;  %v289_v9 = vmul.f32 %v285_v47, %v1077_v48  ;;  %v299_v54 = vmul.f32 %v295_v53, %v1081_v49  ;;  %v328_v43 = vmul.f32 %v325_v63, %v1065_v42  ;;  %s1176_s30 = sld [smem:[#allocation3 + $0x12]] }
  0x42   : > { %v331_v36 = vadd.f32 %v327_v51, %v321_v1  ;;  %v302_v17 = vadd.f32 %v298_v60, %v292_v8  ;;  %v338_v57 = vmul.f32 %v1102_v5, %v983_v21  ;;  %v348_v51 = vmul.f32 %v986_v22, %v1108_v7  ;;  %s1225_s4 = sld [smem:[#allocation3 + $0x14]] }
  0x43   : > { %v340_v16 = vadd.f32 %v336_v52, %v330_v4  ;;  %v293_v44 = vadd.f32 %v289_v9, %v283_v15  ;;  %v309_v47 = vmul.f32 %v305_v56, %v1085_v50  ;;  %v319_v52 = vmul.f32 %v315_v61, %v1097_v62  ;;  %s1234_s5 = sld [smem:[#allocation3 + $0x1d]] }
  0x44   : > { %v341_v39 = vadd.f32 %v337_v55, %v331_v36  ;;  %v312_v10 = vadd.f32 %v308_v11, %v302_v17  ;;  %v329_v59 = vmul.f32 %v325_v63, %v1106_v6  ;;  %v1159_v60 = vstv %s1116_s21  ;;  %s1240_s6 = sld [smem:[#allocation3 + $0x15]] }
  0x45   : > { %v350_v53 = vadd.f32 %v346_v58, %v340_v16  ;;  %v303_v55 = vadd.f32 %v299_v54, %v293_v44  ;;  %v1162_v15 = vstv %s1122_s22  ;;  %v370_v17 = vmul.f32 %v1159_v60, %v970_v18  ;;  %s1248_s7 = sld [smem:[#allocation3 + $0x16]]  ;;  %s571_s22 = scalar_lea.vmem (%p908_p5), %s1435_s2, %s776_s19 }
  0x46   : > { %v351_v36 = vadd.f32 %v347_v3, %v341_v39  ;;  %v322_v16 = vadd.f32 %v318_v46, %v312_v10  ;;  %v1169_v61 = vstv %s1128_s23  ;;  %v1174_v3 = vstv %s1136_s24  ;;  %s1262_s8 = sld [smem:[#allocation3 + $0x17]] }
  0x47   : > { %v360_v56 = vadd.f32 %v356_v0, %v350_v53  ;;  %v313_v58 = vadd.f32 %v309_v47, %v303_v55  ;;  %v382_v1 = vmul.f32 %v1169_v61, %v974_v19  ;;  %v376_v0 = vadd.f32 %v1162_v15, %v370_v17  ;;  %s1268_s9 = sld [smem:[#allocation3 + $0x18]] }
  0x48   : > { %v361_v63 = vadd.f32 %v357_v2, %v351_v36  ;;  %v332_v46 = vadd.f32 %v328_v43, %v322_v16  ;;  %v392_v2 = vmul.f32 %v1174_v3, %v978_v20  ;;  %v1186_v4 = vstv %s1140_s25  ;;  %s1279_s11 = sld [smem:[#allocation3 + $0x19]] }
  0x49   : > { %364 = vst [vmem:[%s1179_s3] sm:$0xff] %v360_v56  ;;  %v323_v8 = vadd.f32 %v319_v52, %v313_v58  ;;  %v339_v11 = vmul.f32 %v1102_v5, %v1028_v32  ;;  %v1192_v9 = vstv %s1144_s26  ;;  %v358_v43 = vmul.f32 %v989_v23, %v1113_v45  ;;  %s1291_s14 = sld [smem:[#allocation3 + $0x1a]] }
  0x4a   : > { %365 = vst [vmem:[%s1179_s3 + $0x8] sm:$0xff] %v361_v63  ;;  %v342_v54 = vadd.f32 %v338_v57, %v332_v46  ;;  %v386_v39 = vadd.f32 %v382_v1, %v376_v0  ;;  %v402_v44 = vmul.f32 %v1186_v4, %v993_v24  ;;  %v349_v53 = vmul.f32 %v1049_v37, %v1108_v7  ;;  %s1306_s15 = sld [smem:[#allocation3 + $0x1b]] }
  0x4b   : > { %v333_v47 = vadd.f32 %v329_v59, %v323_v8  ;;  %v359_v10 = vmul.f32 %v1052_v38, %v1113_v45  ;;  %v1203_v52 = vstv %s1152_s27  ;;  %v412_v36 = vmul.f32 %v1192_v9, %v997_v25  ;;  %s1319_s17 = sld [smem:[#allocation3 + $0x1c]] }
  0x4c   : > { %v352_v5 = vadd.f32 %v348_v51, %v342_v54  ;;  %v396_v57 = vadd.f32 %v392_v2, %v386_v39  ;;  %v1208_v55 = vstv %s1156_s28  ;;  %v1211_v16 = vstv %s1164_s29 }
  0x4d   : > { %v343_v56 = vadd.f32 %v339_v11, %v333_v47  ;;  %v371_v59 = vmul.f32 %v1159_v60, %v1007_v27  ;;  %v383_v7 = vmul.f32 %v1169_v61, %v1013_v28  ;;  %v422_v51 = vmul.f32 %v1203_v52, %v1001_v26 }
  0x4e   : > { %v362_v45 = vadd.f32 %v358_v43, %v352_v5  ;;  %v406_v17 = vadd.f32 %v402_v44, %v396_v57  ;;  %v1220_v58 = vstv %s1176_s30  ;;  %v393_v46 = vmul.f32 %v1174_v3, %v1017_v29 }
  0x4f   : > { %v353_v63 = vadd.f32 %v349_v53, %v343_v56  ;;  %v377_v1 = vadd.f32 %v1162_v15, %v371_v59  ;;  %v432_v2 = vmul.f32 %v1208_v55, %v947_v12  ;;  %v442_v8 = vmul.f32 %v950_v13, %v1211_v16 }
  0x50   : > { %366 = vst [vmem:[%s1179_s3 + $0x10] sm:$0xff] %v362_v45  ;;  %v416_v0 = vadd.f32 %v412_v36, %v406_v17  ;;  %v403_v11 = vmul.f32 %v1186_v4, %v1021_v30  ;;  %v372_v39 = vmul.f32 %v1159_v60, %v1038_v34  ;;  %v384_v44 = vmul.f32 %v1169_v61, %v1042_v35  ;;  %v1458_v36 = vld [vmem:[#allocation8_spill] sm:$0xff] }
  0x51   : > { %v363_v54 = vadd.f32 %v359_v10, %v353_v63  ;;  %v387_v43 = vadd.f32 %v383_v7, %v377_v1  ;;  %v452_v53 = vmul.f32 %v953_v14, %v1220_v58  ;;  %v413_v5 = vmul.f32 %v1192_v9, %v1025_v31  ;;  %v1459_v7 = vld [vmem:[#allocation12_spill] sm:$0xff]  ;;  %v1461_v1 = vld [vmem:[#allocation10_spill] sm:$0xff] }
  0x52   : > { %v426_v47 = vadd.f32 %v422_v51, %v416_v0  ;;  %v423_v57 = vmul.f32 %v1203_v52, %v1034_v33  ;;  %v433_v56 = vmul.f32 %v1208_v55, %v1458_v36  ;;  %v378_v59 = vadd.f32 %v1162_v15, %v372_v39  ;;  %v1460_v51 = vld [vmem:[#allocation9_spill] sm:$0xff] }
  0x53   : > { %367 = vst [vmem:[%s1179_s3 + $0x18] sm:$0xff] %v363_v54  ;;  %v397_v10 = vadd.f32 %v393_v46, %v387_v43  ;;  %v394_v45 = vmul.f32 %v1174_v3, %v1459_v7  ;;  %v443_v63 = vmul.f32 %v1460_v51, %v1211_v16  ;;  %v453_v0 = vmul.f32 %v1461_v1, %v1220_v58  ;;  %v1462_v33 = vld [vmem:[#allocation13_spill] sm:$0xff] }
  0x54   : > { %v436_v17 = vadd.f32 %v432_v2, %v426_v47  ;;  %v373_v14 = vmul.f32 %v1159_v60, %v1462_v33  ;;  %v388_v54 = vadd.f32 %v384_v44, %v378_v59  ;;  %v404_v43 = vmul.f32 %v1186_v4, %v1057_v40 }
  0x55   : > { %v407_v46 = vadd.f32 %v403_v11, %v397_v10  ;;  %v385_v39 = vmul.f32 %v1169_v61, %v1077_v48  ;;  %v414_v47 = vmul.f32 %v1192_v9, %v1061_v41  ;;  %v395_v11 = vmul.f32 %v1174_v3, %v1081_v49 }
  0x56   : > { %v446_v2 = vadd.f32 %v442_v8, %v436_v17  ;;  %v379_v60 = vadd.f32 %v1162_v15, %v373_v14  ;;  %v398_v10 = vadd.f32 %v394_v45, %v388_v54  ;;  %v424_v61 = vmul.f32 %v1203_v52, %v1065_v42 }
  0x57   : > { %v417_v44 = vadd.f32 %v413_v5, %v407_v46  ;;  %v434_v8 = vmul.f32 %v1208_v55, %v983_v21  ;;  %v405_v14 = vmul.f32 %v1186_v4, %v1085_v50  ;;  %v415_v15 = vmul.f32 %v1192_v9, %v1097_v62 }
  0x58   : > { %v456_v59 = vadd.f32 %v452_v53, %v446_v2  ;;  %v389_v17 = vadd.f32 %v385_v39, %v379_v60  ;;  %v408_v5 = vadd.f32 %v404_v43, %v398_v10  ;;  %v1286_v45 = vstv %s1225_s4 }
  0x59   : > { %v427_v3 = vadd.f32 %v423_v57, %v417_v44  ;;  %v1289_v46 = vstv %s1234_s5  ;;  %v467_v53 = vmul.f32 %v1286_v45, %v970_v18  ;;  %v1297_v39 = vstv %s1240_s6 }
  0x5a   : > { %753 = vst [vmem:[%s1179_s3 + $0x20] sm:$0xff] %v456_v59  ;;  %v399_v54 = vadd.f32 %v395_v11, %v389_v17  ;;  %v1300_v4 = vstv %s1248_s7  ;;  %v418_v57 = vadd.f32 %v414_v47, %v408_v5  ;;  %v425_v43 = vmul.f32 %v1203_v52, %v1106_v6 }
  0x5b   : > { %v437_v9 = vadd.f32 %v433_v56, %v427_v3  ;;  %v479_v2 = vmul.f32 %v1297_v39, %v974_v19  ;;  %v473_v11 = vadd.f32 %v1289_v46, %v467_v53  ;;  %v489_v18 = vmul.f32 %v1300_v4, %v978_v20 }
  0x5c   : > { %v409_v60 = vadd.f32 %v405_v14, %v399_v54  ;;  %v1312_v44 = vstv %s1262_s8  ;;  %v428_v56 = vadd.f32 %v424_v61, %v418_v57  ;;  %v444_v52 = vmul.f32 %v986_v22, %v1211_v16 }
  0x5d   : > { %v447_v10 = vadd.f32 %v443_v63, %v437_v9  ;;  %v1317_v47 = vstv %s1268_s9  ;;  %v435_v59 = vmul.f32 %v1208_v55, %v1028_v32  ;;  %v483_v17 = vadd.f32 %v479_v2, %v473_v11 }
  0x5e   : > { %v419_v19 = vadd.f32 %v415_v15, %v409_v60  ;;  %v499_v20 = vmul.f32 %v1312_v44, %v993_v24  ;;  %v438_v63 = vadd.f32 %v434_v8, %v428_v56  ;;  %v454_v61 = vmul.f32 %v989_v23, %v1220_v58 }
  0x5f   : > { %v457_v14 = vadd.f32 %v453_v0, %v447_v10  ;;  %v1328_v3 = vstv %s1279_s11  ;;  %v445_v54 = vmul.f32 %v1049_v37, %v1211_v16  ;;  %v493_v15 = vadd.f32 %v489_v18, %v483_v17 }
  0x60   : > { %v429_v5 = vadd.f32 %v425_v43, %v419_v19  ;;  %v509_v55 = vmul.f32 %v1317_v47, %v997_v25  ;;  %v448_v53 = vadd.f32 %v444_v52, %v438_v63  ;;  %v455_v24 = vmul.f32 %v1052_v38, %v1220_v58  ;;  %v1463_v63 = vld [vmem:[#allocation7_spill] sm:$0xff] }
  0x61   : > { %754 = vst [vmem:[%s1179_s3 + $0x28] sm:$0xff] %v457_v14  ;;  %v1338_v0 = vstv %s1291_s14  ;;  %v468_v8 = vmul.f32 %v1286_v45, %v1007_v27  ;;  %v503_v57 = vadd.f32 %v499_v20, %v493_v15  ;;  %v519_v16 = vmul.f32 %v1328_v3, %v1001_v26 }
  0x62   : > { %v439_v9 = vadd.f32 %v435_v59, %v429_v5  ;;  %v480_v25 = vmul.f32 %v1297_v39, %v1013_v28  ;;  %v458_v43 = vadd.f32 %v454_v61, %v448_v53  ;;  %v538_v2 = vstv %s1306_s15  ;;  %v1464_v61 = vld [vmem:[#allocation11_spill] sm:$0xff] }
  0x63   : > { %v474_v60 = vadd.f32 %v1289_v46, %v468_v8  ;;  %v490_v58 = vmul.f32 %v1300_v4, %v1017_v29  ;;  %v513_v18 = vadd.f32 %v509_v55, %v503_v57  ;;  %v529_v27 = vmul.f32 %v1338_v0, %v947_v12 }
  0x64   : > { %v449_v11 = vadd.f32 %v445_v54, %v439_v9  ;;  %755 = vst [vmem:[%s1179_s3 + $0x30] sm:$0xff] %v458_v43  ;;  %v548_v10 = vstv %s1319_s17  ;;  %v500_v26 = vmul.f32 %v1312_v44, %v1021_v30  ;;  %v469_v28 = vmul.f32 %v1286_v45, %v1038_v34 }
  0x65   : > { %v484_v56 = vadd.f32 %v480_v25, %v474_v60  ;;  %v523_v19 = vadd.f32 %v519_v16, %v513_v18  ;;  %v539_v59 = vmul.f32 %v950_v13, %v538_v2  ;;  %v481_v29 = vmul.f32 %v1297_v39, %v1042_v35 }
  0x66   : > { %v459_v52 = vadd.f32 %v455_v24, %v449_v11  ;;  %v510_v12 = vmul.f32 %v1317_v47, %v1025_v31  ;;  %v475_v20 = vadd.f32 %v1289_v46, %v469_v28  ;;  %v491_v14 = vmul.f32 %v1300_v4, %v1459_v7 }
  0x67   : > { %v494_v17 = vadd.f32 %v490_v58, %v484_v56  ;;  %v533_v30 = vadd.f32 %v529_v27, %v523_v19  ;;  %v549_v34 = vmul.f32 %v1463_v63, %v548_v10  ;;  %v520_v5 = vmul.f32 %v1328_v3, %v1464_v61 }
  0x68   : > { %756 = vst [vmem:[%s1179_s3 + $0x38] sm:$0xff] %v459_v52  ;;  %v485_v54 = vadd.f32 %v481_v29, %v475_v20  ;;  %v501_v35 = vmul.f32 %v1312_v44, %v1057_v40  ;;  %v470_v31 = vmul.f32 %v1286_v45, %v1462_v33  ;;  %v530_v7 = vmul.f32 %v1338_v0, %v1458_v36 }
  0x69   : > { %v504_v13 = vadd.f32 %v500_v26, %v494_v17  ;;  %v543_v15 = vadd.f32 %v539_v59, %v533_v30  ;;  %v511_v55 = vmul.f32 %v1317_v47, %v1061_v41  ;;  %v482_v53 = vmul.f32 %v1297_v39, %v1077_v48 }
  0x6a   : > { %v495_v8 = vadd.f32 %v491_v14, %v485_v54  ;;  %v476_v9 = vadd.f32 %v1289_v46, %v470_v31  ;;  %v492_v40 = vmul.f32 %v1300_v4, %v1081_v49  ;;  %v540_v33 = vmul.f32 %v1460_v51, %v538_v2 }
  0x6b   : > { %v514_v24 = vadd.f32 %v510_v12, %v504_v13  ;;  %v553_v57 = vadd.f32 %v549_v34, %v543_v15  ;;  %v521_v45 = vmul.f32 %v1328_v3, %v1065_v42  ;;  %v502_v41 = vmul.f32 %v1312_v44, %v1085_v50 }
  0x6c   : > { %v505_v16 = vadd.f32 %v501_v35, %v495_v8  ;;  %v486_v25 = vadd.f32 %v482_v53, %v476_v9  ;;  %v550_v48 = vmul.f32 %v1461_v1, %v548_v10  ;;  %v531_v46 = vmul.f32 %v1338_v0, %v983_v21 }
  0x6d   : > { %v524_v36 = vadd.f32 %v520_v5, %v514_v24  ;;  %767 = vst [vmem:[%s1179_s3 + $0x40] sm:$0xff] %v553_v57  ;;  %v512_v51 = vmul.f32 %v1317_v47, %v1097_v62  ;;  %v541_v42 = vmul.f32 %v986_v22, %v538_v2  ;;  %v522_v50 = vmul.f32 %v1328_v3, %v1106_v6 }
  0x6e   : > { %v515_v39 = vadd.f32 %v511_v55, %v505_v16  ;;  %v496_v4 = vadd.f32 %v492_v40, %v486_v25  ;;  %v551_v1 = vmul.f32 %v989_v23, %v548_v10  ;;  %v532_v18 = vmul.f32 %v1338_v0, %v1028_v32  ;;  %v622_v23 = vld [vmem:[%s1179_s3] sm:$0xff] (%p908_p5)  ;;  %v624_v32 = vld [vmem:[%s1179_s3 + $0x8] sm:$0xff] (%p908_p5) }
  0x6f   : > { %v534_v49 = vadd.f32 %v530_v7, %v524_v36  ;;  %v542_v22 = vmul.f32 %v1049_v37, %v538_v2  ;;  %v552_v26 = vmul.f32 %v1052_v38, %v548_v10  ;;  %v626_v37 = vld [vmem:[%s1179_s3 + $0x10] sm:$0xff] (%p908_p5)  ;;  %623 = vst [vmem:[%s571_s22] sm:$0xff] (%p908_p5), %v622_v23  ;;  %v628_v38 = vld [vmem:[%s1179_s3 + $0x18] sm:$0xff] (%p908_p5)  ;;  %v630_v0 = vld [vmem:[%s1179_s3 + $0x20] sm:$0xff] (%p908_p5) }
  0x70   : > { %v525_v60 = vadd.f32 %v521_v45, %v515_v39  ;;  %v506_v58 = vadd.f32 %v502_v41, %v496_v4  ;;  %625 = vst [vmem:[%s571_s22 + $0x8] sm:$0xff] (%p908_p5), %v624_v32  ;;  %v632_v2 = vld [vmem:[%s1179_s3 + $0x28] sm:$0xff] (%p908_p5)  ;;  %v634_v10 = vld [vmem:[%s1179_s3 + $0x30] sm:$0xff] (%p908_p5)  ;;  %v636_v28 = vld [vmem:[%s1179_s3 + $0x38] sm:$0xff] (%p908_p5) }
  0x71   : > { %v544_v43 = vadd.f32 %v540_v33, %v534_v49  ;;  %627 = vst [vmem:[%s571_s22 + $0x10] sm:$0xff] (%p908_p5), %v626_v37 }
  0x72   : > { %v535_v21 = vadd.f32 %v531_v46, %v525_v60  ;;  %v516_v11 = vadd.f32 %v512_v51, %v506_v58  ;;  %629 = vst [vmem:[%s571_s22 + $0x18] sm:$0xff] (%p908_p5), %v628_v38 }
  0x73   : > { %v554_v44 = vadd.f32 %v550_v48, %v544_v43  ;;  %631 = vst [vmem:[%s571_s22 + $0x40] sm:$0xff] (%p908_p5), %v630_v0 }
  0x74   : > { %v545_v62 = vadd.f32 %v541_v42, %v535_v21  ;;  %v526_v47 = vadd.f32 %v522_v50, %v516_v11  ;;  %633 = vst [vmem:[%s571_s22 + $0x48] sm:$0xff] (%p908_p5), %v632_v2  ;;  %v638_v52 = vld [vmem:[%s1179_s3 + $0x40] sm:$0xff] (%p908_p5) }
  0x75   : > { %768 = vst [vmem:[%s1179_s3 + $0x48] sm:$0xff] %v554_v44 }
  0x76   : > { %v555_v27 = vadd.f32 %v551_v1, %v545_v62  ;;  %v536_v56 = vadd.f32 %v532_v18, %v526_v47  ;;  %635 = vst [vmem:[%s571_s22 + $0x50] sm:$0xff] (%p908_p5), %v634_v10 }
  0x77   : > { %637 = vst [vmem:[%s571_s22 + $0x58] sm:$0xff] (%p908_p5), %v636_v28 }
  0x78   : > { %769 = vst [vmem:[%s1179_s3 + $0x50] sm:$0xff] %v555_v27  ;;  %v546_v6 = vadd.f32 %v542_v22, %v536_v56  ;;  %568 = sbr.rel (!%p908_p5) target bundleno = 133 (0x85), region = 74 }
  0x79   : > { %639 = vst [vmem:[%s571_s22 + $0x80] sm:$0xff] (%p908_p5), %v638_v52 }
  0x7a   : > { %v556_v3 = vadd.f32 %v552_v26, %v546_v6 }
  0x7c   : > { %770 = vst [vmem:[%s1179_s3 + $0x58] sm:$0xff] %v556_v3  ;;  %v640_v19 = vld [vmem:[%s1179_s3 + $0x48] sm:$0xff] (%p908_p5) }
  0x7d   : > { %641 = vst [vmem:[%s571_s22 + $0x88] sm:$0xff] %v640_v19 }
  0x7f   : > { %v642_v59 = vld [vmem:[%s1179_s3 + $0x50] sm:$0xff] }
  0x80   : > { %643 = vst [vmem:[%s571_s22 + $0x90] sm:$0xff] %v642_v59 }
  0x83   : > { %v644_v29 = vld [vmem:[%s1179_s3 + $0x58] sm:$0xff] }
  0x84   : > { %645 = vst [vmem:[%s571_s22 + $0x98] sm:$0xff] %v644_v29 }
  0x85 PF: > { %p10_p13 = scmp.ge.s32.totalorder %s892_s13, 4   ;;  %s1465_s9 = smov %s851_s10 }
  0x86   : > { %s1466_s10 = smov %s902_s16  ;;  %s1467_s11 = smov %s892_s13 }
  0x87   :  { %12 = sbr.rel (!%p10_p13) target bundleno = 2 (0x2), region = 148 }
  0x8c   :  { %661 = vsyncpa [#allocation4], 1 }
  0x8d   :  { %663 = vsyncpa [#allocation4 + $0x1], 1 }

</bundles_post_ra>
